<compile_context>
chip_gen: v6e
topology: v6e:2x2x1
jax: 0.10.0
libtpu: 0.0.40
codegen_flags: <defaults>
</compile_context>

<pallas_src>
import jax
import jax.numpy as jnp
from jax.experimental import pallas as pl
from jax.experimental.pallas import tpu as pltpu

SYNSET_LOGIT_RANGE = 10.0   # module-level constant referenced by the PyTorch code
BIGN = 15.0                 # GateObjectLogit.BIGN
ONE = 1.0                   # GateObjectLogit.ONE


def _round_up(x, m):
    return ((x + m - 1) // m) * m


def _gated_synset_kernel(x_ref, w_ref, shift_ref, out_ref):
    # x_ref     : VMEM [TB, C, T_HW]   native dtype (f32 or bf16)
    # w_ref     : VMEM [C, 1]          f32 conv weight (out_channels == 1)
    # shift_ref : VMEM [TB, 1]         f32 per-batch: bias - BIGN * (1 - obj_presence)
    # out_ref   : VMEM [TB, T_HW]      f32
    x = x_ref[...].astype(jnp.float32)            # cast on VPU; HBM traffic stays native dtype
    w = w_ref[...]                                # [C, 1] broadcasts over lanes & batch

    # 1x1 conv with a single output channel: elementwise multiply + sublane
    # reduce over the channel axis (VPU + XLU; avoids an M=1 MXU matmul).
    logits = jnp.sum(x * w, axis=1)               # [TB, T_HW], f32

    # conv bias + GateObjectLogit penalty, fused per batch row.
    logits = logits + shift_ref[...]              # [TB, 1] broadcast

    # Bounded logits: tanh(logits / R) * R  (EUP tanh, f32 math).
    out_ref[...] = jnp.tanh(logits * (1.0 / SYNSET_LOGIT_RANGE)) * SYNSET_LOGIT_RANGE


def gated_synset_predictor(shared_features, obj_presence, conv_weight, conv_bias, objind):
    """shared_features: [B, C, H, W] (NCHW, any float dtype -- NOT up-cast here)
       obj_presence:    [B, num_obj]
       conv_weight:     [1, C, 1, 1]  (Conv2d(dim, 1, kernel_size=1) weight)
       conv_bias:       [1]
       returns          [B, H, W] float32
    """
    B, C, H, W = shared_features.shape
    HW = H * W

    x = shared_features.reshape(B, C, HW)                       # native dtype, no cast
    w = conv_weight.reshape(C, 1).astype(jnp.float32)
    gate = obj_presence[:, objind].astype(jnp.float32)          # [B]
    shift = conv_bias.reshape(()).astype(jnp.float32) - BIGN * (ONE - gate)   # [B]

    # --- tiling -----------------------------------------------------------
    TB = min(8, B)                                  # batches folded per grid step
    B_pad = _round_up(B, TB)

    itemsize = jnp.dtype(x.dtype).itemsize
    # ~4 MiB per x tile => ~8 MiB double-buffered: safe for v7x's smaller
    # scoped VMEM while big enough to sit near HBM roofline on v5e/v6e.
    max_lanes = max(128, ((4 * 1024 * 1024) // (TB * C * itemsize)) // 128 * 128)
    T_HW = min(max_lanes, _round_up(HW, 128))       # lane-dense tile width
    HW_pad = _round_up(HW, T_HW)

    if B_pad != B or HW_pad != HW:
        x = jnp.pad(x, ((0, B_pad - B), (0, 0), (0, HW_pad - HW)))
    if B_pad != B:
        shift = jnp.pad(shift, (0, B_pad - B))
    shift = shift.reshape(B_pad, 1)

    grid = (B_pad // TB, HW_pad // T_HW)

    out = pl.pallas_call(
        _gated_synset_kernel,
        out_shape=jax.ShapeDtypeStruct((B_pad, HW_pad), jnp.float32),
        grid=grid,
        in_specs=[
            pl.BlockSpec((TB, C, T_HW), lambda bi, hi: (bi, 0, hi)),   # x tile
            pl.BlockSpec((C, 1), lambda bi, hi: (0, 0)),               # w (replicated)
            pl.BlockSpec((TB, 1), lambda bi, hi: (bi, 0)),             # per-batch shift
        ],
        out_specs=pl.BlockSpec((TB, T_HW), lambda bi, hi: (bi, hi)),
        compiler_params=pltpu.CompilerParams(
            dimension_semantics=("parallel", "parallel")),
    )(x, w, shift)

    return out[:B, :HW].reshape(B, H, W)


def _reference(shared_features, obj_presence, conv_weight, conv_bias, objind):
    # Plain-JAX reference mirroring the PyTorch forward exactly (true f32 math).
    x = shared_features.astype(jnp.float32)
    logits = jnp.einsum("bchw,oc->bohw", x, conv_weight.reshape(1, -1).astype(jnp.float32),
                        precision="highest") + conv_bias.reshape(1, 1, 1, 1)
    obj_pres = obj_presence[:, objind:objind + 1].astype(jnp.float32)[..., None, None]
    logits = logits - BIGN * (ONE - obj_pres)
    logits = jnp.squeeze(logits, axis=1)                                  # [B,H,W]
    return jnp.tanh(logits / SYNSET_LOGIT_RANGE) * SYNSET_LOGIT_RANGE


if __name__ == "__main__":
    key = jax.random.PRNGKey(0)
    B, C, H, W = 2, 32, 16, 16
    NUM_OBJ = 4
    OBJIND = 1

    k1, k2, k3, k4 = jax.random.split(key, 4)
    shared_features = jax.random.normal(k1, (B, C, H, W), dtype=jnp.float32)
    obj_presence = jax.random.uniform(k2, (B, NUM_OBJ), dtype=jnp.float32)
    conv_weight = jax.random.normal(k3, (1, C, 1, 1), dtype=jnp.float32) * 0.1
    conv_bias = jax.random.normal(k4, (1,), dtype=jnp.float32) * 0.1

    # f32 input path
    out = jax.block_until_ready(
        gated_synset_predictor(shared_features, obj_presence, conv_weight, conv_bias, OBJIND))
    ref = _reference(shared_features, obj_presence, conv_weight, conv_bias, OBJIND)
    assert out.shape == (B, H, W)
    assert jnp.allclose(out, ref, atol=1e-3, rtol=1e-3), "f32 mismatch vs reference"

    # bf16 input path: native dtype streamed straight into the kernel (no wrapper upcast).
    x_bf16 = shared_features.astype(jnp.bfloat16)
    out_bf16 = jax.block_until_ready(
        gated_synset_predictor(x_bf16, obj_presence, conv_weight, conv_bias, OBJIND))
    ref_bf16 = _reference(x_bf16.astype(jnp.float32), obj_presence, conv_weight, conv_bias, OBJIND)
    assert out_bf16.shape == (B, H, W)
    assert jnp.allclose(out_bf16, ref_bf16, atol=3e-2, rtol=3e-2), "bf16 mismatch vs reference"

    print("KERNEL_OK")
</pallas_src>

<mosaic_0001>
module attributes {stable_mosaic.version = 11 : i64} {
  func.func @_gated_synset_kernel(%arg0: i32, %arg1: i32, %arg2: memref<2x32x256xf32, #tpu.memory_space<vmem>>, %arg3: memref<32x1xf32, #tpu.memory_space<vmem>>, %arg4: memref<2x1xf32, #tpu.memory_space<vmem>>, %arg5: memref<2x256xf32, #tpu.memory_space<vmem>>) attributes {dimension_semantics = [#tpu.dimension_semantics<parallel>, #tpu.dimension_semantics<parallel>], iteration_bounds = array<i64: 1, 1>, scalar_prefetch = 0 : i64, scratch_operands = 0 : i64, tpu.core_type = #tpu.core_type<tc>, window_params = [{transform_indices = @transform_0, window_bounds = array<i64: 2, 32, 256>}, {pipeline_mode = #tpu.pipeline_mode<synchronous>, transform_indices = @transform_1, window_bounds = array<i64: 32, 1>}, {transform_indices = @transform_2, window_bounds = array<i64: 2, 1>}, {transform_indices = @transform_3, window_bounds = array<i64: 2, 256>}]} {
    %c0 = arith.constant 0 : index
    %c0_0 = arith.constant 0 : index
    %c0_1 = arith.constant 0 : index
    %0 = vector.load %arg2[%c0, %c0_0, %c0_1] : memref<2x32x256xf32, #tpu.memory_space<vmem>>, vector<2x32x256xf32>
    %c0_2 = arith.constant 0 : index
    %c0_3 = arith.constant 0 : index
    %1 = vector.load %arg3[%c0_2, %c0_3] : memref<32x1xf32, #tpu.memory_space<vmem>>, vector<32x1xf32>
    %2 = vector.shape_cast %1 : vector<32x1xf32> to vector<1x32x1xf32>
    %3 = vector.broadcast %2 : vector<1x32x1xf32> to vector<2x32x256xf32>
    %4 = arith.mulf %0, %3 : vector<2x32x256xf32>
    %cst = arith.constant dense<0.000000e+00> : vector<2x256xf32>
    %5 = vector.multi_reduction <add>, %4, %cst [1] : vector<2x32x256xf32> to vector<2x256xf32>
    %c0_4 = arith.constant 0 : index
    %c0_5 = arith.constant 0 : index
    %6 = vector.load %arg4[%c0_4, %c0_5] : memref<2x1xf32, #tpu.memory_space<vmem>>, vector<2x1xf32>
    %7 = vector.broadcast %6 : vector<2x1xf32> to vector<2x256xf32>
    %8 = arith.addf %5, %7 : vector<2x256xf32>
    %cst_6 = arith.constant 1.000000e-01 : f32
    %9 = vector.broadcast %cst_6 : f32 to vector<2x256xf32>
    %10 = arith.mulf %8, %9 : vector<2x256xf32>
    %11 = math.tanh %10 : vector<2x256xf32>
    %cst_7 = arith.constant 1.000000e+01 : f32
    %12 = vector.broadcast %cst_7 : f32 to vector<2x256xf32>
    %13 = arith.mulf %11, %12 : vector<2x256xf32>
    %c0_8 = arith.constant 0 : index
    %c0_9 = arith.constant 0 : index
    %14 = vector.load %arg5[%c0_8, %c0_9] : memref<2x256xf32, #tpu.memory_space<vmem>>, vector<2x256xf32>
    tpu.vector_store %arg5[%c0_8, %c0_9], %13 {strides = array<i32>} : memref<2x256xf32, #tpu.memory_space<vmem>>, vector<2x256xf32>,
    return
  }
  func.func @transform_0(%arg0: i32, %arg1: i32) -> (i32, i32, i32) {
    %c0_i32 = arith.constant 0 : i32
    %c0_i32_0 = arith.constant 0 : i32
    return %arg0, %c0_i32, %arg1 : i32, i32, i32
  }
  func.func @transform_1(%arg0: i32, %arg1: i32) -> (i32, i32) {
    %c0_i32 = arith.constant 0 : i32
    %c0_i32_0 = arith.constant 0 : i32
    %c0_i32_1 = arith.constant 0 : i32
    return %c0_i32, %c0_i32_0 : i32, i32
  }
  func.func @transform_2(%arg0: i32, %arg1: i32) -> (i32, i32) {
    %c0_i32 = arith.constant 0 : i32
    %c0_i32_0 = arith.constant 0 : i32
    return %arg0, %c0_i32 : i32, i32
  }
  func.func @transform_3(%arg0: i32, %arg1: i32) -> (i32, i32) {
    %c0_i32 = arith.constant 0 : i32
    return %arg0, %arg1 : i32, i32
  }
}

</mosaic_0001>

<bundles_post_ra>
// kernel: tpu_custom_call.1
= control target key start
LH: loop header
LB: loop body
LE: loop exit
PB: predicated region body
PF: predicated region fallthrough
CT: control target
= control target key end

     0   :  { %8 = vsyncpa [#allocation3], 0  ;;  %s302_s0 = inlined_call_operand.hbm [shape: f32[2,32,256], index: 0, kind: input, shape index: {}]   ;;  %s303_s1 = inlined_call_operand.vmem [shape: f32[32,1], index: 1, kind: input, shape index: {}]   ;;  %s304_s2 = inlined_call_operand.vmem [shape: f32[2,1], index: 2, kind: input, shape index: {}]   ;;  %s305_s3 = inlined_call_operand.hbm [shape: f32[2,256], index: 3, kind: output, shape index: {}]  }
   0x1   :  { %9 = vsyncpa [#allocation4], 0  ;;  %s255_s12 = smov [#allocation2]  }
   0x2   :  { %s15_s13 = sshll.u32 %s255_s12, 4  ;;  %s16_s13 = int_to_ptr.vmem [resolvable:$true] %s15_s13 }
   0x3   :  { %s219_s14 = scalar_lea.vmem %s16_s13, 2048  ;;  %p224_p1 = scmp.lt.s32.totalorder %s16_s13, %s16_s13 }
   0x4   :  { %p220_p0 = scmp.ne.s32.totalorder %s16_s13, %s219_s14  ;;  %p225_p2 = scmp.lt.s32.totalorder %s219_s14, %s219_s14 }
   0x6   :  { %p226_p3 = por %p225_p2, %p224_p1 }
   0x8   :  { %p227_p4 = pnand %p226_p3, %p220_p0 }
   0xa   :  { %230 = shalt.err (!%p227_p4)
}
   0xb   :  { %s256_s15 = smov 256   ;;  %s257_s16 = smov 16  }
   0xc   :  { %21 = dma.hbm_to_vmem [thread:$0]  %s302_s0, 2048, %s16_s13, [#allocation3], %s256_s15, %s256_s15, %s257_s16  }
   0xd   :  { %251 = dma.done.wait [#allocation3], 2048  }
   0xe   :  { %252 = vsyncadd [#allocation3], 4294965248  ;;  %v258_v0 = vmov 0   ;;  %v47_v1 = vld [vmem:[%s303_s1 + $0x10] sm:$0xff]  ;;  %v45_v2 = vld [vmem:[%s303_s1] sm:$0xff]  ;;  %vm170_vm0 = vcmask 1041409  }
   0xf   :  { %202 = vset.pattern.permute.xlu1 %v258_v0  ;;  %201 = vset.pattern.permute.xlu0 %v258_v0  ;;  %v48_v3 = vld [vmem:[%s303_s1 + $0x18] sm:$0xff]  ;;  %v46_v4 = vld [vmem:[%s303_s1 + $0x8] sm:$0xff]  ;;  %v121_v5 = vld [vmem:[%s304_s2] sm:$0x3]  ;;  %vm172_vm1 = vcmask 1043459   ;;  %vm174_vm2 = vcmask 1045509  }
  0x10   :  { %61 = vperm.xlu1 %202, %v47_v1   ;;  %51 = vperm.xlu0 %201, %v45_v2   ;;  %v29_v8 = vld [vmem:[#allocation2] sm:$0xff]  ;;  %v30_v9 = vld [vmem:[#allocation2 + $0x8] sm:$0xff]  ;;  %v31_v13 = vld [vmem:[#allocation2 + $0x10] sm:$0xff]  ;;  %s260_s1 = smov [#allocation5]   ;;  %vm176_vm3 = vcmask 1047559  }
  0x11   :  { %v33_v10 = vld [vmem:[#allocation2 + $0x20] sm:$0xff]  ;;  %v38_v12 = vld [vmem:[#allocation2 + $0x48] sm:$0xff]  ;;  %v32_v14 = vld [vmem:[#allocation2 + $0x18] sm:$0xff]  ;;  %s186_s2 = sshll.u32 %s260_s1, 4  ;;  %s187_s2 = int_to_ptr.vmem [resolvable:$true] %s186_s2 }
  0x12   :  { %v37_v11 = vld [vmem:[#allocation2 + $0x40] sm:$0xff]  ;;  %v39_v15 = vld [vmem:[#allocation2 + $0x50] sm:$0xff]  ;;  %v40_v16 = vld [vmem:[#allocation2 + $0x58] sm:$0xff]  ;;  %s231_s28 = scalar_lea.vmem %s187_s2, 64  ;;  %p236_p6 = scmp.lt.s32.totalorder %s187_s2, %s187_s2 }
  0x13   :  { %v34_v17 = vld [vmem:[#allocation2 + $0x28] sm:$0xff]  ;;  %v41_v18 = vld [vmem:[#allocation2 + $0x60] sm:$0xff]  ;;  %v35_v25 = vld [vmem:[#allocation2 + $0x30] sm:$0xff]  ;;  %p232_p5 = scmp.ne.s32.totalorder %s187_s2, %s231_s28  ;;  %p237_p7 = scmp.lt.s32.totalorder %s231_s28, %s231_s28 }
  0x14   :  { %66 = vperm.xlu1 %202, %v48_v3   ;;  %56 = vperm.xlu0 %201, %v46_v4   ;;  %v42_v19 = vld [vmem:[#allocation2 + $0x68] sm:$0xff]  ;;  %v36_v27 = vld [vmem:[#allocation2 + $0x38] sm:$0xff]  ;;  %v43_v28 = vld [vmem:[#allocation2 + $0x70] sm:$0xff] }
  0x15   :  { %v44_v29 = vld [vmem:[#allocation2 + $0x78] sm:$0xff]  ;;  %p238_p8 = por %p237_p7, %p236_p6 }
  0x17   :  { %p239_p9 = pnand %p238_p8, %p232_p5 }
  0x18   :  { %124 = vperm.xlu0 %201, %v121_v5  }
  0x8b   :  { %v62_v6 = vpop.permute.xlu1 %61  ;;  %v52_v7 = vpop.permute.xlu0 %51 }
  0x8c   :  { %v69_v21 = vmul.f32 %v52_v7, %v29_v8  ;;  %v70_v22 = vmul.f32 %v52_v7, %v30_v9  ;;  %v77_v23 = vmul.f32 %v52_v7, %v37_v11  ;;  %v78_v24 = vmul.f32 %v52_v7, %v38_v12 }
  0x8d   :  { %v73_v34 = vmul.f32 %v62_v6, %v33_v10  ;;  %v74_v35 = vmul.f32 %v62_v6, %v34_v17  ;;  %v81_v36 = vmul.f32 %v62_v6, %v41_v18  ;;  %v82_v37 = vmul.f32 %v62_v6, %v42_v19 }
  0x8f   :  { %v57_v20 = vpop.permute.xlu0 %56  ;;  %v67_v26 = vpop.permute.xlu1 %66 }
  0x90   :  { %v71_v30 = vmul.f32 %v57_v20, %v31_v13  ;;  %v72_v31 = vmul.f32 %v57_v20, %v32_v14  ;;  %v79_v32 = vmul.f32 %v57_v20, %v39_v15  ;;  %v80_v33 = vmul.f32 %v57_v20, %v40_v16 }
  0x91   :  { %v75_v42 = vmul.f32 %v67_v26, %v35_v25  ;;  %v76_v43 = vmul.f32 %v67_v26, %v36_v27  ;;  %v83_v44 = vmul.f32 %v67_v26, %v43_v28  ;;  %v84_v45 = vmul.f32 %v67_v26, %v44_v29 }
  0x92   :  { %v85_v38 = vadd.f32 %v71_v30, %v69_v21  ;;  %v94_v39 = vadd.f32 %v72_v31, %v70_v22  ;;  %v103_v40 = vadd.f32 %v79_v32, %v77_v23  ;;  %v112_v41 = vadd.f32 %v80_v33, %v78_v24 }
  0x93   :  { %v125_v2 = vpop.permute.xlu0 %124  ;;  %v259_v24 = vmov 1983009808   ;;  %v153_v26 = vlaneseq }
  0x94   :  { %v86_v46 = vadd.f32 %v85_v38, %v73_v34  ;;  %v95_v47 = vadd.f32 %v94_v39, %v74_v35  ;;  %v104_v48 = vadd.f32 %v103_v40, %v81_v36  ;;  %v113_v49 = vadd.f32 %v112_v41, %v82_v37 }
  0x95   :  { %v126_v11 = vrot.slane %v125_v2, 1  ;;  %v151_v25 = vunpack.c.l.s4 %v259_v24  ;;  %v154_v29 = vshrl.u32 %v153_v26, 7 }
  0x96   :  { %v87_v50 = vadd.f32 %v86_v46, %v75_v42  ;;  %v96_v51 = vadd.f32 %v95_v47, %v76_v43  ;;  %v105_v52 = vadd.f32 %v104_v48, %v83_v44  ;;  %v114_v53 = vadd.f32 %v113_v49, %v84_v45 }
  0x97   :  { %v152_v28 = vunpack.c.0.s8 %v151_v25 }
  0x98   :  { %v88_v54 = vrot.slane %v87_v50, 4  ;;  %v97_v55 = vrot.slane %v96_v51, 4  ;;  %v106_v56 = vrot.slane %v105_v52, 4  ;;  %v115_v57 = vrot.slane %v114_v53, 4 }
  0x99   :  { %v155_v36 = vsub.s32 %v152_v28, %v154_v29 }
  0x9a   :  { %v89_v58 = vadd.f32 %v88_v54, %v87_v50  ;;  %v98_v59 = vadd.f32 %v97_v55, %v96_v51  ;;  %v107_v60 = vadd.f32 %v106_v56, %v105_v52  ;;  %v116_v61 = vadd.f32 %v115_v57, %v114_v53 }
  0x9c   :  { %v90_v62 = vrot.slane %v89_v58, 2  ;;  %v99_v63 = vrot.slane %v98_v59, 2  ;;  %v108_v0 = vrot.slane %v107_v60, 2  ;;  %v117_v1 = vrot.slane %v116_v61, 2 }
  0x9e   :  { %v91_v3 = vadd.f32 %v90_v62, %v89_v58  ;;  %v100_v4 = vadd.f32 %v99_v63, %v98_v59  ;;  %v109_v5 = vadd.f32 %v108_v0, %v107_v60  ;;  %v118_v6 = vadd.f32 %v117_v1, %v116_v61 }
  0xa0   :  { %v92_v7 = vrot.slane %v91_v3, 1  ;;  %v101_v8 = vrot.slane %v100_v4, 1  ;;  %v110_v9 = vrot.slane %v109_v5, 1  ;;  %v119_v10 = vrot.slane %v118_v6, 1 }
  0xa2   :  { %v93_v12 = vadd.f32 %v92_v7, %v91_v3  ;;  %v102_v13 = vadd.f32 %v101_v8, %v100_v4  ;;  %v111_v14 = vadd.f32 %v110_v9, %v109_v5  ;;  %v120_v15 = vadd.f32 %v119_v10, %v118_v6 }
  0xa4   :  { %v129_v16 = vadd.f32 %v125_v2, %v93_v12  ;;  %v130_v17 = vadd.f32 %v125_v2, %v102_v13  ;;  %v131_v18 = vadd.f32 %v126_v11, %v111_v14  ;;  %v132_v19 = vadd.f32 %v126_v11, %v120_v15 }
  0xa6   :  { %v133_v20 = vmul.f32 0.1, %v129_v16  ;;  %v134_v21 = vmul.f32 0.1, %v130_v17  ;;  %v135_v22 = vmul.f32 0.1, %v131_v18 }
  0xa7   :  { %v136_v23 = vmul.f32 0.1, %v132_v19 }
  0xa8   :  { %203 = vtanh.f32 %v133_v20 }
  0xa9   :  { %205 = vtanh.f32 %v134_v21 }
  0xaa   :  { %207 = vtanh.f32 %v135_v22 }
  0xab   :  { %209 = vtanh.f32 %v136_v23 }
  0xb5   :  { %v204_v27 = vpop.eup %203 }
  0xb6   :  { %v206_v30 = vpop.eup %205  ;;  %v141_v32 = vmul.f32 10.0, %v204_v27 }
  0xb7   :  { %v208_v31 = vpop.eup %207  ;;  %v142_v33 = vmul.f32 10.0, %v206_v30 }
  0xb8   :  { %v210_v34 = vpop.eup %209  ;;  %v143_v35 = vmul.f32 10.0, %v208_v31 }
  0xb9   :  { %v144_v37 = vmul.f32 10.0, %v210_v34  ;;  %v149_v38 = vcombine.low %v141_v32, %v142_v33 }
  0xbb   :  { %v157_v39 = vcombine.low %v143_v35, %v144_v37  ;;  %v156_v41 = vrot.slane %v149_v38, %v155_v36 }
  0xbd   :  { %v164_v40 = vrot.slane %v157_v39, %v155_v36 }
  0xbf   :  { %v169_v42 = vrot.slane %v164_v40, 7 }
  0xc1   :  { %v171_v43 = vsel %vm170_vm0, %v169_v42, %v156_v41 }
  0xc2   :  { %v173_v44 = vsel %vm172_vm1, %v169_v42, %v171_v43 }
  0xc3   :  { %v175_v45 = vsel %vm174_vm2, %v169_v42, %v173_v44 }
  0xc4   :  { %v177_v46 = vsel %vm176_vm3, %v169_v42, %v175_v45 }
  0xc5   :  { %179 = vst [vmem:[#allocation5] sm:$0xf] %v177_v46 }
  0xc6   :  { %242 = shalt.err (!%p239_p9)
}
  0xc7   :  { %189 = dma.vmem_to_hbm [thread:$0]  %s187_s2, 64, %s305_s3, [#allocation4]  }
  0xc8   :  { %253 = dma.done.wait [#allocation4], 64  }
  0xc9   :  { %254 = vsyncadd [#allocation4], 4294967232 }
  0xca   :  { %193 = vsyncpa [#allocation3], 1 }
  0xcb   :  { %194 = vsyncpa [#allocation4], 1 }

</bundles_post_ra>
